<compile_context>
chip_gen: v7x
topology: tpu7x:2x2x1
jax: 0.10.0
libtpu: 0.0.40
codegen_flags: <defaults>
</compile_context>

<pallas_src>
import functools

import jax
import jax.numpy as jnp
from jax.experimental import pallas as pl
from jax.experimental.pallas import tpu as pltpu


def _round_up(n: int, m: int) -> int:
    return ((n + m - 1) // m) * m


# ---------------------------------------------------------------------------------------
# Kernel
# ---------------------------------------------------------------------------------------
def _nbeats_fc_kernel(num_layers, ctx, ctx_p, needs_pad, x_ref, *refs):
    """refs = (w0, b0, ..., w_{L-1}, b_{L-1}, out_ref[, xpad_ref]).

    x_ref : (tb, ctx)      io_dtype batch tile (unpadded context, blocked over the grid).
    w_l   : (in_p, out_p)  param_dtype, whole array resident in VMEM (loaded once).
    b_l   : (1, out_p)     f32, whole array resident in VMEM.
    out   : (tb, width_p)  io_dtype batch tile (lane-dense store).
    xpad  : (tb, ctx_p)    io_dtype VMEM staging tile (only when ctx % 128 != 0).
    """
    if needs_pad:
        out_ref, xpad_ref = refs[-2], refs[-1]
        rows = x_ref.shape[0]
        # Zero the K-pad lanes, then stage the unpadded x tile in front of them.  The zero
        # pad columns meet zero weight rows, so padding is mathematically exact.
        xpad_ref[:, pl.ds(ctx, ctx_p - ctx)] = jnp.zeros(
            (rows, ctx_p - ctx), xpad_ref.dtype)
        xpad_ref[:, pl.ds(0, ctx)] = x_ref[...]
        h = xpad_ref[...]
    else:
        out_ref = refs[-1]
        h = x_ref[...]

    for l in range(num_layers):
        w = refs[2 * l][...]
        b = refs[2 * l + 1][...]
        # bf16 (or f32) MXU matmul with f32 accumulation; bias-add + ReLU are cheap VPU
        # filler far below the matmul slot.
        h = jnp.dot(h.astype(w.dtype), w, preferred_element_type=jnp.float32) + b
        h = jnp.maximum(h, 0.0)  # nn.ReLU()

    out_ref[...] = h.astype(out_ref.dtype)


# ---------------------------------------------------------------------------------------
# Host-side helpers
# ---------------------------------------------------------------------------------------
def _pad_params(params, ctx_p, width_p, param_dtype):
    """Zero-pad (W, b) so every matmul K/N dim is a multiple of 128 (exact: zeros)."""
    padded = []
    in_p = ctx_p
    for (w, b) in params:
        in_f, out_f = w.shape
        w_p = jnp.zeros((in_p, width_p), param_dtype).at[:in_f, :out_f].set(
            w.astype(param_dtype))
        b_p = jnp.zeros((1, width_p), jnp.float32).at[:, :out_f].set(
            jnp.reshape(b, (1, -1)).astype(jnp.float32))
        padded.append((w_p, b_p))
        in_p = width_p
    return padded


def _vmem_capacity_bytes() -> int:
    """Physical per-core VMEM (v5e/v6e: 128 MiB, v7x: 64 MiB); conservative fallback."""
    try:
        cap = int(pltpu.get_tpu_info().vmem_capacity_bytes)
        if cap > 0:
            return cap
    except Exception:
        pass
    return 64 * 1024 * 1024


def _min_grid_steps() -> int:
    """>=2 grid steps per TensorCore on dual-TC chips (v7x megacore sharding + per-core
    double-buffer overlap); single-TC chips (v5e/v6e) prefer fewer, bigger steps."""
    try:
        n_tc = int(getattr(jax.devices()[0], "num_cores", 1) or 1)
    except Exception:
        n_tc = 1
    return 2 * n_tc if n_tc > 1 else 1


def _choose_batch_tile(requested, B, ctx, ctx_p, width_p, weight_bytes,
                       io_itemsize, budget, min_grid_steps):
    """Pick a 128-multiple batch tile whose estimated VMEM footprint fits the budget."""
    gran = 128
    tb = min(_round_up(max(int(requested), 1), gran), _round_up(B, gran))
    if min_grid_steps > 1 and B > gran:
        tb = min(tb, max(gran, _round_up(-(-B // min_grid_steps), gran)))

    def footprint(t):
        io = 2 * t * (ctx + width_p) * io_itemsize      # double-buffered x / out blocks
        pad_scratch = t * ctx_p * io_itemsize           # in-kernel K-pad staging tile
        act = 3 * t * max(ctx_p, width_p) * 4           # live f32 activations / temps
        return weight_bytes + io + pad_scratch + act

    while tb > gran and footprint(tb) > budget:
        tb -= gran
    while tb > 8 and footprint(tb) > budget:
        tb = max(8, (tb // 2 // 8) * 8)
    return tb, footprint(tb)


# ---------------------------------------------------------------------------------------
# Forward wrapper
# ---------------------------------------------------------------------------------------
def nbeats_block_forward(x, params, *, batch_tile=1024,
                         param_dtype=jnp.bfloat16, io_dtype=jnp.bfloat16,
                         trim_output=True):
    """NBEATSBlock.forward(x) == fc_stack(x) via one Pallas kernel.

    x:      (B, context_length)
    params: list of (W, b); W: (in_features, out_features) == PyTorch weight.T,
            b: (1, out_features). Layer 0: in=context_length; later layers: in=width.
    param_dtype / io_dtype: bfloat16 is the performance default (f32 accumulation);
            pass jnp.float32 for exact-path checking.
    trim_output: True -> (B, width) drop-in semantics; False -> padded (B, width_p) slab
            so a downstream (padded) theta/backcast matmul avoids an extra HBM round trip.
    """
    B, ctx = x.shape
    width = params[-1][0].shape[1]
    num_layers = len(params)

    ctx_p = _round_up(ctx, 128)       # K padded to 128 only (v5e MXU is 4x128^2)
    width_p = _round_up(width, 128)   # lane-dense stores / full MXU N
    needs_pad = ctx_p != ctx
    io_itemsize = jnp.dtype(io_dtype).itemsize

    cap = _vmem_capacity_bytes()
    budget = int(0.70 * cap)          # generation-aware tile-selection budget

    padded = _pad_params(params, ctx_p, width_p, param_dtype)
    weight_bytes = sum(int(w.size) * w.dtype.itemsize + int(b.size) * b.dtype.itemsize
                       for (w, b) in padded)
    if weight_bytes > budget:
        # TODO(synk): block the widest hidden-layer weight over N with an extra 'arbitrary'
        # grid axis instead of whole-array VMEM residency (matters for very wide stacks on
        # v7x's 64 MiB VMEM).
        raise ValueError(
            f"fc_stack weights ({weight_bytes} B) exceed the VMEM budget ({budget} B); "
            "use param_dtype=jnp.bfloat16 or a narrower width.")

    tb, footprint = _choose_batch_tile(batch_tile, B, ctx, ctx_p, width_p, weight_bytes,
                                       io_itemsize, budget, _min_grid_steps())
    grid = (pl.cdiv(B, tb),)          # ragged last block handled by masked loads/stores

    # In a fused pipeline the caller should already hand us io_dtype; this is a no-op then.
    x = x.astype(io_dtype)
    flat_params = [t for wb in padded for t in wb]

    in_specs = [pl.BlockSpec((tb, ctx), lambda i: (i, 0))]
    for _ in range(2 * num_layers):
        # Whole-array VMEM residency: loaded once, no per-step double buffering.
        in_specs.append(pl.BlockSpec(memory_space=pltpu.MemorySpace.VMEM))

    scratch_shapes = [pltpu.VMEM((tb, ctx_p), io_dtype)] if needs_pad else []

    # vmem_limit: actual footprint + ~25% headroom, floored at 32 MiB, capped below physical.
    vmem_limit = int(min(int(0.9 * cap), max(32 * 1024 * 1024, footprint * 5 // 4)))

    rows_computed = grid[0] * tb
    flops = 2 * rows_computed * (ctx_p * width_p + (num_layers - 1) * width_p * width_p)
    bytes_accessed = B * ctx * io_itemsize + B * width_p * io_itemsize + weight_bytes

    out = pl.pallas_call(
        functools.partial(_nbeats_fc_kernel, num_layers, ctx, ctx_p, needs_pad),
        out_shape=jax.ShapeDtypeStruct((B, width_p), io_dtype),
        grid=grid,
        in_specs=in_specs,
        out_specs=pl.BlockSpec((tb, width_p), lambda i: (i, 0)),
        scratch_shapes=scratch_shapes,
        compiler_params=pltpu.CompilerParams(
            dimension_semantics=("parallel",),
            vmem_limit_bytes=vmem_limit,
        ),
        cost_estimate=pl.CostEstimate(
            flops=int(flops), transcendentals=0, bytes_accessed=int(bytes_accessed)),
    )(x, *flat_params)

    if trim_output:
        return out[:, :width]
    return out


# ---------------------------------------------------------------------------------------
# Synthetic init + pure-JAX reference
# ---------------------------------------------------------------------------------------
def init_nbeats_params(key, context_length, width, num_block_layers):
    """PyTorch nn.Linear-style uniform(-1/sqrt(in), 1/sqrt(in)) init; W stored (in, out)."""
    params = []
    in_f = context_length
    for _ in range(num_block_layers):
        key, kw, kb = jax.random.split(key, 3)
        bound = 1.0 / float(in_f) ** 0.5
        w = jax.random.uniform(kw, (in_f, width), jnp.float32, -bound, bound)
        b = jax.random.uniform(kb, (1, width), jnp.float32, -bound, bound)
        params.append((w, b))
        in_f = width
    return params


def _reference_forward(x, params, param_dtype, io_dtype):
    """Mirrors the kernel's dtype flow (io_dtype activations, param_dtype matmul operands,
    f32 accumulation, f32 bias/ReLU, io_dtype output)."""
    h = x.astype(io_dtype)
    for (w, b) in params:
        h = jnp.dot(h.astype(param_dtype), w.astype(param_dtype),
                    preferred_element_type=jnp.float32) + b.astype(jnp.float32)
        h = jnp.maximum(h, 0.0)
    return h.astype(io_dtype)


if __name__ == "__main__":
    # Small shapes consistent with NBEATSBlock.forward: x is (batch, context_length).
    batch = 200              # ragged batch -> exercises masked last output block
    context_length = 72      # not a multiple of 128 -> exercises in-kernel K padding
    width = 96               # pads to 128 (lane-dense output)
    num_block_layers = 3     # Linear(ctx->w)+ReLU, then 2x (Linear(w->w)+ReLU)

    key = jax.random.PRNGKey(0)
    key, kx = jax.random.split(key)
    x = jax.random.normal(kx, (batch, context_length), jnp.float32)
    params = init_nbeats_params(key, context_length, width, num_block_layers)

    # --- f32 weights + f32 I/O: checking path ------------------------------------------
    out_f32 = jax.block_until_ready(
        nbeats_block_forward(x, params, batch_tile=128,
                             param_dtype=jnp.float32, io_dtype=jnp.float32))
    ref_f32 = _reference_forward(x, params, jnp.float32, jnp.float32)
    assert out_f32.shape == (batch, width)
    assert jnp.allclose(out_f32, ref_f32, atol=1e-4, rtol=1e-4), "f32 mismatch vs reference"

    # --- bf16 weights + bf16 I/O (performance default on v5e/v6e/v7x), f32 accumulate ---
    out_bf16 = jax.block_until_ready(nbeats_block_forward(x, params))
    ref_bf16 = _reference_forward(x, params, jnp.bfloat16, jnp.bfloat16)
    assert out_bf16.shape == (batch, width)
    assert jnp.allclose(out_bf16.astype(jnp.float32), ref_bf16.astype(jnp.float32),
                        atol=2e-2, rtol=2e-2), "bf16 mismatch vs reference"

    # --- padded-output path (for fusing into a larger, padded N-BEATS stack) ------------
    out_padded = jax.block_until_ready(
        nbeats_block_forward(x, params, trim_output=False))
    assert out_padded.shape == (batch, _round_up(width, 128))
    assert jnp.allclose(out_padded[:, :width].astype(jnp.float32),
                        ref_bf16.astype(jnp.float32), atol=2e-2, rtol=2e-2)

    print("KERNEL_OK")
</pallas_src>

<mosaic_0001>
module attributes {stable_mosaic.version = 11 : i64} {
  func.func @_nbeats_fc_kernel(%arg0: i32, %arg1: memref<128x72xf32, #tpu.memory_space<vmem>>, %arg2: memref<128x128xf32, #tpu.memory_space<vmem>>, %arg3: memref<1x128xf32, #tpu.memory_space<vmem>>, %arg4: memref<128x128xf32, #tpu.memory_space<vmem>>, %arg5: memref<1x128xf32, #tpu.memory_space<vmem>>, %arg6: memref<128x128xf32, #tpu.memory_space<vmem>>, %arg7: memref<1x128xf32, #tpu.memory_space<vmem>>, %arg8: memref<128x128xf32, #tpu.memory_space<vmem>>, %arg9: memref<128x128xf32, #tpu.memory_space<vmem>>) attributes {dimension_semantics = [#tpu.dimension_semantics<parallel>], iteration_bounds = array<i64: 2>, scalar_prefetch = 0 : i64, scratch_operands = 1 : i64, tpu.core_type = #tpu.core_type<tc>, window_params = [{transform_indices = @transform_0, window_bounds = array<i64: 128, 72>}, {pipeline_mode = #tpu.pipeline_mode<synchronous>, transform_indices = @transform_1, window_bounds = array<i64: 128, 128>}, {pipeline_mode = #tpu.pipeline_mode<synchronous>, transform_indices = @transform_2, window_bounds = array<i64: 1, 128>}, {pipeline_mode = #tpu.pipeline_mode<synchronous>, transform_indices = @transform_3, window_bounds = array<i64: 128, 128>}, {pipeline_mode = #tpu.pipeline_mode<synchronous>, transform_indices = @transform_4, window_bounds = array<i64: 1, 128>}, {pipeline_mode = #tpu.pipeline_mode<synchronous>, transform_indices = @transform_5, window_bounds = array<i64: 128, 128>}, {pipeline_mode = #tpu.pipeline_mode<synchronous>, transform_indices = @transform_6, window_bounds = array<i64: 1, 128>}, {transform_indices = @transform_7, window_bounds = array<i64: 128, 128>}]} {
    %cst = arith.constant 0.000000e+00 : f32
    %0 = vector.broadcast %cst : f32 to vector<128x56xf32>
    %c0 = arith.constant 0 : index
    %c72 = arith.constant 72 : index
    %1 = vector.load %arg9[%c0, %c72] : memref<128x128xf32, #tpu.memory_space<vmem>>, vector<128x56xf32>
    tpu.vector_store %arg9[%c0, %c72], %0 {strides = array<i32>} : memref<128x128xf32, #tpu.memory_space<vmem>>, vector<128x56xf32>,
    %c0_0 = arith.constant 0 : index
    %c0_1 = arith.constant 0 : index
    %2 = vector.load %arg1[%c0_0, %c0_1] : memref<128x72xf32, #tpu.memory_space<vmem>>, vector<128x72xf32>
    %c0_2 = arith.constant 0 : index
    %c0_3 = arith.constant 0 : index
    %3 = vector.load %arg9[%c0_2, %c0_3] : memref<128x128xf32, #tpu.memory_space<vmem>>, vector<128x72xf32>
    tpu.vector_store %arg9[%c0_2, %c0_3], %2 {strides = array<i32>} : memref<128x128xf32, #tpu.memory_space<vmem>>, vector<128x72xf32>,
    %c0_4 = arith.constant 0 : index
    %c0_5 = arith.constant 0 : index
    %4 = vector.load %arg9[%c0_4, %c0_5] : memref<128x128xf32, #tpu.memory_space<vmem>>, vector<128x128xf32>
    %c0_6 = arith.constant 0 : index
    %c0_7 = arith.constant 0 : index
    %5 = vector.load %arg2[%c0_6, %c0_7] : memref<128x128xf32, #tpu.memory_space<vmem>>, vector<128x128xf32>
    %c0_8 = arith.constant 0 : index
    %c0_9 = arith.constant 0 : index
    %6 = vector.load %arg3[%c0_8, %c0_9] : memref<1x128xf32, #tpu.memory_space<vmem>>, vector<1x128xf32>
    %cst_10 = arith.constant dense<0.000000e+00> : vector<128x128xf32>
    %7 = tpu.matmul %4, %5, %cst_10 {dimension_numbers = #tpu.dot_dimension_numbers<[1], [0], [0], [1], [0, 0, 1, 1], [], []>} : vector<128x128xf32>, vector<128x128xf32>, vector<128x128xf32> -> vector<128x128xf32>
    %8 = vector.broadcast %6 : vector<1x128xf32> to vector<128x128xf32>
    %9 = arith.addf %7, %8 : vector<128x128xf32>
    %cst_11 = arith.constant 0.000000e+00 : f32
    %10 = vector.broadcast %cst_11 : f32 to vector<128x128xf32>
    %11 = arith.maximumf %9, %10 : vector<128x128xf32>
    %c0_12 = arith.constant 0 : index
    %c0_13 = arith.constant 0 : index
    %12 = vector.load %arg4[%c0_12, %c0_13] : memref<128x128xf32, #tpu.memory_space<vmem>>, vector<128x128xf32>
    %c0_14 = arith.constant 0 : index
    %c0_15 = arith.constant 0 : index
    %13 = vector.load %arg5[%c0_14, %c0_15] : memref<1x128xf32, #tpu.memory_space<vmem>>, vector<1x128xf32>
    %cst_16 = arith.constant dense<0.000000e+00> : vector<128x128xf32>
    %14 = tpu.matmul %11, %12, %cst_16 {dimension_numbers = #tpu.dot_dimension_numbers<[1], [0], [0], [1], [0, 0, 1, 1], [], []>} : vector<128x128xf32>, vector<128x128xf32>, vector<128x128xf32> -> vector<128x128xf32>
    %15 = vector.broadcast %13 : vector<1x128xf32> to vector<128x128xf32>
    %16 = arith.addf %14, %15 : vector<128x128xf32>
    %cst_17 = arith.constant 0.000000e+00 : f32
    %17 = vector.broadcast %cst_17 : f32 to vector<128x128xf32>
    %18 = arith.maximumf %16, %17 : vector<128x128xf32>
    %c0_18 = arith.constant 0 : index
    %c0_19 = arith.constant 0 : index
    %19 = vector.load %arg6[%c0_18, %c0_19] : memref<128x128xf32, #tpu.memory_space<vmem>>, vector<128x128xf32>
    %c0_20 = arith.constant 0 : index
    %c0_21 = arith.constant 0 : index
    %20 = vector.load %arg7[%c0_20, %c0_21] : memref<1x128xf32, #tpu.memory_space<vmem>>, vector<1x128xf32>
    %cst_22 = arith.constant dense<0.000000e+00> : vector<128x128xf32>
    %21 = tpu.matmul %18, %19, %cst_22 {dimension_numbers = #tpu.dot_dimension_numbers<[1], [0], [0], [1], [0, 0, 1, 1], [], []>} : vector<128x128xf32>, vector<128x128xf32>, vector<128x128xf32> -> vector<128x128xf32>
    %22 = vector.broadcast %20 : vector<1x128xf32> to vector<128x128xf32>
    %23 = arith.addf %21, %22 : vector<128x128xf32>
    %cst_23 = arith.constant 0.000000e+00 : f32
    %24 = vector.broadcast %cst_23 : f32 to vector<128x128xf32>
    %25 = arith.maximumf %23, %24 : vector<128x128xf32>
    %c0_24 = arith.constant 0 : index
    %c0_25 = arith.constant 0 : index
    %26 = vector.load %arg8[%c0_24, %c0_25] : memref<128x128xf32, #tpu.memory_space<vmem>>, vector<128x128xf32>
    tpu.vector_store %arg8[%c0_24, %c0_25], %25 {strides = array<i32>} : memref<128x128xf32, #tpu.memory_space<vmem>>, vector<128x128xf32>,
    return
  }
  func.func @transform_0(%arg0: i32) -> (i32, i32) {
    %c0_i32 = arith.constant 0 : i32
    %c0_i32_0 = arith.constant 0 : i32
    return %arg0, %c0_i32 : i32, i32
  }
  func.func @transform_1(%arg0: i32) -> (i32, i32) {
    %c0_i32 = arith.constant 0 : i32
    %c0_i32_0 = arith.constant 0 : i32
    %c0_i32_1 = arith.constant 0 : i32
    return %c0_i32, %c0_i32_0 : i32, i32
  }
  func.func @transform_2(%arg0: i32) -> (i32, i32) {
    %c0_i32 = arith.constant 0 : i32
    %c0_i32_0 = arith.constant 0 : i32
    %c0_i32_1 = arith.constant 0 : i32
    return %c0_i32, %c0_i32_0 : i32, i32
  }
  func.func @transform_3(%arg0: i32) -> (i32, i32) {
    %c0_i32 = arith.constant 0 : i32
    %c0_i32_0 = arith.constant 0 : i32
    %c0_i32_1 = arith.constant 0 : i32
    return %c0_i32, %c0_i32_0 : i32, i32
  }
  func.func @transform_4(%arg0: i32) -> (i32, i32) {
    %c0_i32 = arith.constant 0 : i32
    %c0_i32_0 = arith.constant 0 : i32
    %c0_i32_1 = arith.constant 0 : i32
    return %c0_i32, %c0_i32_0 : i32, i32
  }
  func.func @transform_5(%arg0: i32) -> (i32, i32) {
    %c0_i32 = arith.constant 0 : i32
    %c0_i32_0 = arith.constant 0 : i32
    %c0_i32_1 = arith.constant 0 : i32
    return %c0_i32, %c0_i32_0 : i32, i32
  }
  func.func @transform_6(%arg0: i32) -> (i32, i32) {
    %c0_i32 = arith.constant 0 : i32
    %c0_i32_0 = arith.constant 0 : i32
    %c0_i32_1 = arith.constant 0 : i32
    return %c0_i32, %c0_i32_0 : i32, i32
  }
  func.func @transform_7(%arg0: i32) -> (i32, i32) {
    %c0_i32 = arith.constant 0 : i32
    %c0_i32_0 = arith.constant 0 : i32
    return %arg0, %c0_i32 : i32, i32
  }
}

</mosaic_0001>

<bundles_post_ra>
// kernel: tpu_custom_call.1
= control target key start
LH: loop header
LB: loop body
LE: loop exit
PB: predicated region body
PF: predicated region fallthrough
CT: control target
= control target key end

     0   :  { %12 = vsyncpa [#allocation4], 0  ;;  %s2016_s0 = inlined_call_operand.vmem [shape: f32[200,72], index: 0, kind: input, shape index: {}]   ;;  %s2017_s1 = inlined_call_operand.vmem [shape: f32[128,128], index: 1, kind: input, shape index: {}]   ;;  %s2018_s2 = inlined_call_operand.vmem [shape: f32[1,128], index: 2, kind: input, shape index: {}]   ;;  %s2019_s3 = inlined_call_operand.vmem [shape: f32[128,128], index: 3, kind: input, shape index: {}]   ;;  %s2020_s4 = inlined_call_operand.vmem [shape: f32[1,128], index: 4, kind: input, shape index: {}]   ;;  %s2021_s5 = inlined_call_operand.hbm [shape: f32[128,128], index: 5, kind: input, shape index: {}]   ;;  %s2022_s6 = inlined_call_operand.vmem [shape: f32[1,128], index: 6, kind: input, shape index: {}]   ;;  %s2023_s7 = inlined_call_operand.hbm [shape: f32[200,128], index: 7, kind: output, shape index: {}]  }
   0x1   :  { %13 = vsyncpa [#allocation5], 0 }
   0x2   :  { %15 = vsyncpa [#allocation5 + $0x1], 0  ;;  %s1642_s24 = smov 0   ;;  %s1644_s25 = smov 0  }
   0x3   :  { %s1646_s26 = smov 0   ;;  %s1648_s27 = smov 0  }
   0x4 LB: > { %s1663_s28 = sadd.s32 4294967295, %s1593_s27   ;;  %s1047_s29 = sadd.s32 4294967294, %s1593_s27   ;;  %s1593_s27 = sphi %s1648_s27, %s2038_s27   ;;  %s1589_s26 = sphi %s1646_s26, %s2037_s26   ;;  %s1585_s25 = sphi %s1644_s25, %s2036_s25   ;;  %s1581_s24 = sphi %s1642_s24, %s2035_s24  }
   0x5   : > { %s1667_s30 = sadd.s32 1, %s1593_s27   ;;  %s180_s8 = sadd.s32 1, %s1589_s26 }
   0x6   : > { %s177_s9 = ssub.s32 %s1593_s27, %s1667_s30  ;;  %p190_p0 = scmp.ne.s32.totalorder %s1589_s26, %s1585_s25 }
   0x7   : > { %p178_p1 = scmp.eq.s32.totalorder %s177_s9, 0  ;;  %p191_p2 = scmp.eq.s32.totalorder %s1663_s28, 1 }
   0x8   : > { %p196_p3 = scmp.ne.s32.totalorder %s1585_s25, %s1581_s24  ;;  %p197_p4 = scmp.eq.s32.totalorder %s1047_s29, 1 }
   0x9   : > { %s1678_s10 = scalar_select %p178_p1, %s1589_s26, %s180_s8  }
   0xa   : > { %p1680_p5 = por %p191_p2, %p190_p0  ;;  %p1684_p6 = por %p197_p4, %p196_p3 }
   0xb   : > { %p1048_p7 = scmp.ge.s32.totalorder %s1593_s27, 1  ;;  %p204_p8 = scmp.lt.s32.totalorder %s1593_s27, 3 }
   0xc   : > { %s2026_s11 = scalar_select %p1680_p5, 1, 0 }
   0xd   : > { %s2027_s12 = scalar_select %p1684_p6, 1, 0 }
   0xe   : > { %p2024_p9 = scmp.eq.s32.totalorder %s1663_s28, 0  ;;  %p1691_p10 = pnand %p1048_p7, %p204_p8 }
   0xf   : > { %s1595_s14 = smov [#allocation3]   ;;  %s1499_s19 = scalar_lea.hbm %s2021_s5, 2048 }
  0x10   : > { %s2028_s13 = scalar_select %p1691_p10, 1, 0 }
  0x11   : > { %s228_s15 = sshll.u32 %s1595_s14, 4  ;;  %p1450_p11 = pneg %p1691_p10  ;;  %s229_s15 = int_to_ptr.vmem [resolvable:$true] %s228_s15 }
  0x12   : > { %p1500_p13 = scmp.ne.s32.totalorder %s2021_s5, %s1499_s19  ;;  %p1506_p3 = scmp.lt.u32.totalorder %s1499_s19, %s2021_s5 }
  0x13   : > { %p1699_p12 = pnand %p2024_p9, %p1450_p11 }
  0x15   : > { %p1501_p0 = pneg %p1699_p12 }
  0x17   : > { %p1502_p1 = pnand %p1501_p0, %p1500_p13 }
  0x19   : > { %p1503_p2 = pneg %p1502_p1 }
  0x1b   : > { %p1508_p4 = pnand %p1506_p3, %p1503_p2 }
  0x1d   : > { %1511 = shalt.err (!%p1508_p4)
}
  0x1e   : > { %s1512_s29 = scalar_lea.vmem %s229_s15, 2048  ;;  %p1520_p9 = scmp.lt.s32.totalorder %s229_s15, %s229_s15 }
  0x1f   : > { %p1513_p7 = scmp.ne.s32.totalorder %s229_s15, %s1512_s29  ;;  %p1521_p6 = scmp.lt.s32.totalorder %s1512_s29, %s1512_s29 }
  0x21   : > { %p1515_p8 = pnand %p1513_p7, %p1501_p0  ;;  %p1522_p5 = por %p1521_p6, %p1520_p9 }
  0x23   : > { %p1516_p11 = pneg %p1515_p8 }
  0x25   : > { %p1523_p10 = pnand %p1522_p5, %p1516_p11 }
  0x27   : > { %1526 = shalt.err (!%p1523_p10)
}
  0x28   : > { %s1596_s8 = smov 128   ;;  %s1597_s9 = smov 8  }
  0x29   : > { %1453 = dma.hbm_to_vmem [thread:$0]  (!%p1699_p12), %s2021_s5, 2048, %s229_s15, [#allocation4], %s1596_s8, %s1596_s8, %s1597_s9  }
  0x2a   : > { %p2030_p13 = scmp.ne.s32.totalorder %s2028_s13, 0 }
  0x2b   : > { %p2031_p1 = scmp.eq.s32.totalorder (!%p2030_p13), %s1663_s28, 0 }
  0x2c   : > { %264 = sbr.rel (%p2030_p13) target bundleno = 797 (0x31d), region = 48 }
  0x33   : > { %1572 = dma.done.wait (%p2031_p1), [#allocation4], 2048   ;;  %p2032_p0 = pmov %p2031_p1 }
  0x34   : > { %s1726_s18 = sshll.u32 %s1663_s28, 4  ;;  %vm319_vm0 = vcmask 1048128   ;;  %v1598_v0 = vmov 0.0   ;;  %v385_v1 = vld [vmem:[%s2017_s1] sm:$0xff]  ;;  %v386_v2 = vld [vmem:[%s2017_s1 + $0x8] sm:$0xff]  ;;  %v387_v3 = vld [vmem:[%s2017_s1 + $0x10] sm:$0xff] }
  0x35   : > { %1574 = vsyncadd (%p2032_p0), [#allocation4], 4294965248  ;;  %p305_p5 = scmp.lt.s32.totalorder %s1726_s18, 24  ;;  %320 = vst.msk [vmem:[#allocation2] sm:$0xff] %vm319_vm0, %v1598_v0  ;;  %v1333_v4 = vpack.c.bf16 %v386_v2, %v385_v1  ;;  %v388_v5 = vld [vmem:[%s2017_s1 + $0x18] sm:$0xff]  ;;  %v389_v7 = vld [vmem:[%s2017_s1 + $0x20] sm:$0xff] }
  0x36   : > { %321 = vst.msk [vmem:[#allocation2 + $0x8] sm:$0xff] %vm319_vm0, %v1598_v0  ;;  %322 = vst.msk [vmem:[#allocation2 + $0x10] sm:$0xff] %vm319_vm0, %v1598_v0  ;;  %v1337_v6 = vpack.c.bf16 %v388_v5, %v387_v3  ;;  %v390_v8 = vld [vmem:[%s2017_s1 + $0x28] sm:$0xff]  ;;  %vm352_vm1 = vcmask 588800   ;;  %v391_v9 = vld [vmem:[%s2017_s1 + $0x30] sm:$0xff]  ;;  %s297_s29 = sand.u32 1, %s1585_s25  }
  0x37   : > { %323 = vst.msk [vmem:[#allocation2 + $0x18] sm:$0xff] %vm319_vm0, %v1598_v0  ;;  %324 = vst.msk [vmem:[#allocation2 + $0x20] sm:$0xff] %vm319_vm0, %v1598_v0  ;;  %s306_s13 = scalar_select %p305_p5, %s1726_s18, 24  ;;  %1334 = vmatprep.subr.bf16.mxu0 %v1333_v4  ;;  %v1341_v10 = vpack.c.bf16 %v390_v8, %v389_v7  ;;  %v392_v11 = vld [vmem:[%s2017_s1 + $0x38] sm:$0xff]  ;;  %v393_v20 = vld [vmem:[%s2017_s1 + $0x40] sm:$0xff] }
  0x38   : > { %325 = vst.msk [vmem:[#allocation2 + $0x28] sm:$0xff] %vm319_vm0, %v1598_v0  ;;  %326 = vst.msk [vmem:[#allocation2 + $0x30] sm:$0xff] %vm319_vm0, %v1598_v0  ;;  %1336 = vmatpush3.bf16.msra.mxu0 %v1333_v4  ;;  %v394_v21 = vld [vmem:[%s2017_s1 + $0x48] sm:$0xff]  ;;  %v1345_v25 = vpack.c.bf16 %v392_v11, %v391_v9  ;;  %v569_v31 = vld [vmem:[%s2019_s3] sm:$0xff]  ;;  %s1053_s14 = sshll.u32 %s297_s29, 7  ;;  %p2033_p6 = scmp.ne.s32.totalorder %s2026_s11, 0 }
  0x39   : > { %327 = vst.msk [vmem:[#allocation2 + $0x38] sm:$0xff] %vm319_vm0, %v1598_v0  ;;  %328 = vst.msk [vmem:[#allocation2 + $0x40] sm:$0xff] %vm319_vm0, %v1598_v0  ;;  %s1055_s15 = sshll.u32 %s306_s13, 3  ;;  %1338 = vmatprep.subr.bf16.mxu0 %v1337_v6  ;;  %v570_v32 = vld [vmem:[%s2019_s3 + $0x8] sm:$0xff]  ;;  %v571_v33 = vld [vmem:[%s2019_s3 + $0x10] sm:$0xff]  ;;  %v1349_v37 = vpack.c.bf16 %v394_v21, %v393_v20  ;;  %s1935_s17 = scalar_lea.vmem [#allocation6], %s1053_s14 }
  0x3a   : > { %329 = vst.msk [vmem:[#allocation2 + $0x48] sm:$0xff] %vm319_vm0, %v1598_v0  ;;  %330 = vst.msk [vmem:[#allocation2 + $0x50] sm:$0xff] %vm319_vm0, %v1598_v0  ;;  %s1769_s20 = scalar_lea.vmem %s2016_s0, %s1055_s15  ;;  %v572_v34 = vld [vmem:[%s2019_s3 + $0x18] sm:$0xff]  ;;  %v1365_v35 = vpack.c.bf16 %v570_v32, %v569_v31  ;;  %v573_v39 = vld [vmem:[%s2019_s3 + $0x20] sm:$0xff]  ;;  %s1955_s13 = scalar_lea.sflag [#allocation5], %s297_s29 }
  0x3b   : > { %331 = vst.msk [vmem:[#allocation2 + $0x58] sm:$0xff] %vm319_vm0, %v1598_v0  ;;  %332 = vst.msk [vmem:[#allocation2 + $0x60] sm:$0xff] %vm319_vm0, %v1598_v0  ;;  %v336_v12 = vld [vmem:[%s1769_s20] sm:$0xff]  ;;  %v337_v13 = vld [vmem:[%s1769_s20 + $0x8] sm:$0xff]  ;;  %v1369_v36 = vpack.c.bf16 %v572_v34, %v571_v33  ;;  %s962_s16 = ssub.s32 (%p2033_p6), 25, %s1726_s18 }
  0x3c   : > { %333 = vst.msk [vmem:[#allocation2 + $0x68] sm:$0xff] %vm319_vm0, %v1598_v0  ;;  %334 = vst.msk [vmem:[#allocation2 + $0x70] sm:$0xff] %vm319_vm0, %v1598_v0  ;;  %v338_v14 = vld [vmem:[%s1769_s20 + $0x10] sm:$0xff]  ;;  %v339_v15 = vld [vmem:[%s1769_s20 + $0x18] sm:$0xff]  ;;  %1340 = vmatpush3.bf16.msra.mxu0 %v1337_v6  ;;  %1366 = vmatprep.subr.bf16.mxu1 %v1365_v35  ;;  %p963_p9 = scmp.lt.s32.totalorder (%p2033_p6), %s962_s16, 16 }
  0x3d   : > { %335 = vst.msk [vmem:[#allocation2 + $0x78] sm:$0xff] %vm319_vm0, %v1598_v0  ;;  %v340_v16 = vld [vmem:[%s1769_s20 + $0x20] sm:$0xff]  ;;  %v341_v17 = vld [vmem:[%s1769_s20 + $0x28] sm:$0xff]  ;;  %v342_v18 = vld [vmem:[%s1769_s20 + $0x30] sm:$0xff]  ;;  %1342 = vmatprep.subr.bf16.mxu0 %v1341_v10  ;;  %1368 = vmatpush3.bf16.msra.mxu1 %v1365_v35 }
  0x3e   : > { %353 = vst.msk [vmem:[#allocation2] sm:$0xff] %vm352_vm1, %v336_v12  ;;  %354 = vst.msk [vmem:[#allocation2 + $0x8] sm:$0xff] %vm352_vm1, %v337_v13  ;;  %v343_v19 = vld [vmem:[%s1769_s20 + $0x38] sm:$0xff]  ;;  %v344_v22 = vld [vmem:[%s1769_s20 + $0x40] sm:$0xff]  ;;  %1370 = vmatprep.subr.bf16.mxu1 %v1369_v36 }
  0x3f   : > { %355 = vst.msk [vmem:[#allocation2 + $0x10] sm:$0xff] %vm352_vm1, %v338_v14  ;;  %356 = vst.msk [vmem:[#allocation2 + $0x18] sm:$0xff] %vm352_vm1, %v339_v15  ;;  %v345_v23 = vld [vmem:[%s1769_s20 + $0x48] sm:$0xff]  ;;  %v346_v24 = vld [vmem:[%s1769_s20 + $0x50] sm:$0xff] }
  0x40   : > { %357 = vst.msk [vmem:[#allocation2 + $0x20] sm:$0xff] %vm352_vm1, %v340_v16  ;;  %358 = vst.msk [vmem:[#allocation2 + $0x28] sm:$0xff] %vm352_vm1, %v341_v17  ;;  %v347_v26 = vld [vmem:[%s1769_s20 + $0x58] sm:$0xff]  ;;  %v348_v27 = vld [vmem:[%s1769_s20 + $0x60] sm:$0xff]  ;;  %1344 = vmatpush3.bf16.msra.mxu0 %v1341_v10 }
  0x41   : > { %359 = vst.msk [vmem:[#allocation2 + $0x30] sm:$0xff] %vm352_vm1, %v342_v18  ;;  %360 = vst.msk [vmem:[#allocation2 + $0x38] sm:$0xff] %vm352_vm1, %v343_v19  ;;  %v349_v28 = vld [vmem:[%s1769_s20 + $0x68] sm:$0xff]  ;;  %v350_v29 = vld [vmem:[%s1769_s20 + $0x70] sm:$0xff]  ;;  %1346 = vmatprep.subr.bf16.mxu0 %v1345_v25  ;;  %1372 = vmatpush3.bf16.msra.mxu1 %v1369_v36 }
  0x42   : > { %361 = vst.msk [vmem:[#allocation2 + $0x40] sm:$0xff] %vm352_vm1, %v344_v22  ;;  %362 = vst.msk [vmem:[#allocation2 + $0x48] sm:$0xff] %vm352_vm1, %v345_v23  ;;  %v351_v30 = vld [vmem:[%s1769_s20 + $0x78] sm:$0xff]  ;;  %v574_v40 = vld [vmem:[%s2019_s3 + $0x28] sm:$0xff] }
  0x43   : > { %363 = vst.msk [vmem:[#allocation2 + $0x50] sm:$0xff] %vm352_vm1, %v346_v24  ;;  %364 = vst.msk [vmem:[#allocation2 + $0x58] sm:$0xff] %vm352_vm1, %v347_v26  ;;  %v395_v41 = vld [vmem:[%s2017_s1 + $0x50] sm:$0xff]  ;;  %v396_v42 = vld [vmem:[%s2017_s1 + $0x58] sm:$0xff]  ;;  %v1373_v43 = vpack.c.bf16 %v574_v40, %v573_v39 }
  0x44   : > { %365 = vst.msk [vmem:[#allocation2 + $0x60] sm:$0xff] %vm352_vm1, %v348_v27  ;;  %366 = vst.msk [vmem:[#allocation2 + $0x68] sm:$0xff] %vm352_vm1, %v349_v28  ;;  %1348 = vmatpush3.bf16.msra.mxu0 %v1345_v25  ;;  %v1353_v44 = vpack.c.bf16 %v396_v42, %v395_v41  ;;  %v575_v45 = vld [vmem:[%s2019_s3 + $0x30] sm:$0xff]  ;;  %v576_v46 = vld [vmem:[%s2019_s3 + $0x38] sm:$0xff] }
  0x45   : > { %367 = vst.msk [vmem:[#allocation2 + $0x70] sm:$0xff] %vm352_vm1, %v350_v29  ;;  %368 = vst.msk [vmem:[#allocation2 + $0x78] sm:$0xff] %vm352_vm1, %v351_v30  ;;  %v369_v38 = vld [vmem:[#allocation2] sm:$0xff]  ;;  %1350 = vmatprep.subr.bf16.mxu0 %v1349_v37  ;;  %v398_v48 = vld [vmem:[%s2017_s1 + $0x68] sm:$0xff]  ;;  %1374 = vmatprep.subr.bf16.mxu1 %v1373_v43  ;;  %v1377_v49 = vpack.c.bf16 %v576_v46, %v575_v45 }
  0x46   : > { %1197 = vmatprep.mubr.f32.mxu0 %v369_v38  ;;  %v397_v47 = vld [vmem:[%s2017_s1 + $0x60] sm:$0xff]  ;;  %v578_v52 = vld [vmem:[%s2019_s3 + $0x48] sm:$0xff]  ;;  %v399_v53 = vld [vmem:[%s2017_s1 + $0x70] sm:$0xff]  ;;  %1376 = vmatpush3.bf16.msra.mxu1 %v1373_v43 }
  0x47   : > { %v1357_v50 = vpack.c.bf16 %v398_v48, %v397_v47  ;;  %v577_v51 = vld [vmem:[%s2019_s3 + $0x40] sm:$0xff]  ;;  %v400_v54 = vld [vmem:[%s2017_s1 + $0x78] sm:$0xff]  ;;  %1378 = vmatprep.subr.bf16.mxu1 %v1377_v49  ;;  %v579_v57 = vld [vmem:[%s2019_s3 + $0x50] sm:$0xff] }
  0x48   : > { %1352 = vmatpush3.bf16.msra.mxu0 %v1349_v37  ;;  %v1381_v55 = vpack.c.bf16 %v578_v52, %v577_v51  ;;  %v1361_v56 = vpack.c.bf16 %v400_v54, %v399_v53  ;;  %v580_v58 = vld [vmem:[%s2019_s3 + $0x58] sm:$0xff]  ;;  %v581_v60 = vld [vmem:[%s2019_s3 + $0x60] sm:$0xff]  ;;  %v582_v61 = vld [vmem:[%s2019_s3 + $0x68] sm:$0xff] }
  0x49   : > { %1354 = vmatprep.subr.bf16.mxu0 %v1353_v44  ;;  %v1385_v59 = vpack.c.bf16 %v580_v58, %v579_v57  ;;  %v370_v62 = vld [vmem:[#allocation2 + $0x8] sm:$0xff]  ;;  %v1389_v63 = vpack.c.bf16 %v582_v61, %v581_v60  ;;  %v371_v0 = vld [vmem:[#allocation2 + $0x10] sm:$0xff]  ;;  %v372_v1 = vld [vmem:[#allocation2 + $0x18] sm:$0xff] }
  0x4a   : > { %1380 = vmatpush3.bf16.msra.mxu1 %v1377_v49  ;;  %v373_v2 = vld [vmem:[#allocation2 + $0x20] sm:$0xff]  ;;  %v374_v3 = vld [vmem:[#allocation2 + $0x28] sm:$0xff]  ;;  %v375_v4 = vld [vmem:[#allocation2 + $0x30] sm:$0xff] }
  0x4b   : > { %1382 = vmatprep.subr.bf16.mxu1 %v1381_v55  ;;  %v376_v5 = vld [vmem:[#allocation2 + $0x38] sm:$0xff]  ;;  %v377_v6 = vld [vmem:[#allocation2 + $0x40] sm:$0xff]  ;;  %v378_v7 = vld [vmem:[#allocation2 + $0x48] sm:$0xff] }
  0x4c   : > { %1356 = vmatpush3.bf16.msra.mxu0 %v1353_v44  ;;  %v379_v8 = vld [vmem:[#allocation2 + $0x50] sm:$0xff]  ;;  %v380_v9 = vld [vmem:[#allocation2 + $0x58] sm:$0xff]  ;;  %v381_v10 = vld [vmem:[#allocation2 + $0x60] sm:$0xff] }
  0x4d   : > { %1358 = vmatprep.subr.bf16.mxu0 %v1357_v50  ;;  %v382_v11 = vld [vmem:[#allocation2 + $0x68] sm:$0xff]  ;;  %v383_v12 = vld [vmem:[#allocation2 + $0x70] sm:$0xff]  ;;  %v384_v13 = vld [vmem:[#allocation2 + $0x78] sm:$0xff] }
  0x4e   : > { %1384 = vmatpush3.bf16.msra.mxu1 %v1381_v55  ;;  %v583_v14 = vld [vmem:[%s2019_s3 + $0x70] sm:$0xff]  ;;  %v584_v15 = vld [vmem:[%s2019_s3 + $0x78] sm:$0xff]  ;;  %v753_v17 = vld [vmem:[#allocation3] sm:$0xff] }
  0x4f   : > { %1386 = vmatprep.subr.bf16.mxu1 %v1385_v59  ;;  %v1393_v16 = vpack.c.bf16 %v584_v15, %v583_v14  ;;  %v754_v18 = vld [vmem:[#allocation3 + $0x8] sm:$0xff]  ;;  %v755_v19 = vld [vmem:[#allocation3 + $0x10] sm:$0xff]  ;;  %v756_v21 = vld [vmem:[#allocation3 + $0x18] sm:$0xff] }
  0x50   : > { %1360 = vmatpush3.bf16.msra.mxu0 %v1357_v50  ;;  %v1397_v20 = vpack.c.bf16 %v754_v18, %v753_v17  ;;  %v1401_v22 = vpack.c.bf16 %v756_v21, %v755_v19  ;;  %v757_v23 = vld [vmem:[#allocation3 + $0x20] sm:$0xff]  ;;  %v758_v24 = vld [vmem:[#allocation3 + $0x28] sm:$0xff]  ;;  %v759_v26 = vld [vmem:[#allocation3 + $0x30] sm:$0xff] }
  0x51   : > { %1362 = vmatprep.subr.bf16.mxu0 %v1361_v56  ;;  %v1405_v25 = vpack.c.bf16 %v758_v24, %v757_v23  ;;  %v760_v27 = vld [vmem:[#allocation3 + $0x38] sm:$0xff]  ;;  %v761_v29 = vld [vmem:[#allocation3 + $0x40] sm:$0xff]  ;;  %v762_v30 = vld [vmem:[#allocation3 + $0x48] sm:$0xff] }
  0x52   : > { %1388 = vmatpush3.bf16.msra.mxu1 %v1385_v59  ;;  %v1881_v28 = vpack.c.bf16 %v760_v27, %v759_v26  ;;  %v1884_v31 = vpack.c.bf16 %v762_v30, %v761_v29  ;;  %v763_v32 = vld [vmem:[#allocation3 + $0x50] sm:$0xff]  ;;  %v764_v33 = vld [vmem:[#allocation3 + $0x58] sm:$0xff]  ;;  %v765_v35 = vld [vmem:[#allocation3 + $0x60] sm:$0xff] }
  0x53   : > { %1390 = vmatprep.subr.bf16.mxu1 %v1389_v63  ;;  %v1888_v34 = vpack.c.bf16 %v764_v33, %v763_v32  ;;  %v766_v36 = vld [vmem:[#allocation3 + $0x68] sm:$0xff]  ;;  %v1900_v38 = vld [vmem:[%s2018_s2] ss:$0 sm:$0xff]  ;;  %v767_v23 = vld [vmem:[#allocation3 + $0x70] sm:$0xff] }
  0x54   : > { %1364 = vmatpush3.bf16.msra.mxu0 %v1361_v56  ;;  %v1892_v37 = vpack.c.bf16 %v766_v36, %v765_v35  ;;  %v768_v24 = vld [vmem:[#allocation3 + $0x78] sm:$0xff]  ;;  %v1057_v26 = vld [vmem:[%s2020_s4] ss:$0 sm:$0xff] }
  0x55   : > { %1398 = vmatprep.subr.bf16.mxu0 %v1397_v20 }
  0x56   : > { %1392 = vmatpush3.bf16.msra.mxu1 %v1389_v63 }
  0x57   : > { %1198 = vmatmul.mubr.f32.vlgmr.msra.gmra.mrb[0].mxu0 %v370_v62  ;;  %1394 = vmatprep.subr.bf16.mxu1 %v1393_v16 }
  0x58   : > { %1200 = vmatprep.mubr.f32.mxu0 %v371_v0  ;;  %1400 = vmatpush3.bf16.msra.mxu0 %v1397_v20 }
  0x59   : > { %1402 = vmatprep.subr.bf16.mxu0 %v1401_v22 }
  0x5a   : > { %1396 = vmatpush3.bf16.msra.mxu1 %v1393_v16 }
  0x5b   : > { %1201 = vmatmul.mubr.f32.gmra.mrb[2].mxu0 %v372_v1  ;;  %1429 = vmatprep.subr.bf16.mxu1 %v1397_v20 }
  0x5c   : > { %1203 = vmatprep.mubr.f32.mxu0 %v373_v2  ;;  %1404 = vmatpush3.bf16.msra.mxu0 %v1401_v22 }
  0x5d   : > { %1406 = vmatprep.subr.bf16.mxu0 %v1405_v25 }
  0x5f   : > { %1204 = vmatmul.mubr.f32.gmra.mrb[4].mxu0 %v374_v3 }
  0x60   : > { %1206 = vmatprep.mubr.f32.mxu0 %v375_v4  ;;  %1408 = vmatpush3.bf16.msra.mxu0 %v1405_v25 }
  0x61   : > { %1410 = vmatprep.subr.bf16.mxu0 %v1881_v28 }
  0x63   : > { %1207 = vmatmul.mubr.f32.gmra.mrb[6].mxu0 %v376_v5 }
  0x64   : > { %1209 = vmatprep.mubr.f32.mxu0 %v377_v6  ;;  %1412 = vmatpush3.bf16.msra.mxu0 %v1881_v28 }
  0x65   : > { %1414 = vmatprep.subr.bf16.mxu0 %v1884_v31 }
  0x67   : > { %1210 = vmatmul.mubr.f32.gmra.mrb[8].mxu0 %v378_v7 }
  0x68   : > { %1212 = vmatprep.mubr.f32.mxu0 %v379_v8  ;;  %1416 = vmatpush3.bf16.msra.mxu0 %v1884_v31 }
  0x69   : > { %1418 = vmatprep.subr.bf16.mxu0 %v1888_v34 }
  0x6b   : > { %1213 = vmatmul.mubr.f32.gmra.mrb[10].mxu0 %v380_v9 }
  0x6c   : > { %1215 = vmatprep.mubr.f32.mxu0 %v381_v10  ;;  %1420 = vmatpush3.bf16.msra.mxu0 %v1888_v34 }
  0x6d   : > { %1422 = vmatprep.subr.bf16.mxu0 %v1892_v37 }
  0x6f   : > { %1216 = vmatmul.mubr.f32.gmra.mrb[12].mxu0 %v382_v11 }
  0x70   : > { %1218 = vmatprep.mubr.f32.mxu0 %v383_v12  ;;  %1424 = vmatpush3.bf16.msra.mxu0 %v1892_v37 }
  0x73   : > { %1219 = vmatmul.mubr.f32.gmra.mrb[14].mxu0 %v384_v13 }
 0x12a   : > { %v1199_v39 = vpop.f32.mrb[0].mxu0 }
 0x12b   : > { %v480_v40 = vadd.f32 %v1199_v39, %v1900_v38  ;;  %v474_v41 = vpop.f32.mrb[1].mxu0 }
 0x12c   : > { %v475_v42 = vadd.f32 %v1900_v38, %v474_v41 }
 0x12d   : > { %v554_v45 = vmax.f32 %v480_v40, 0.0 }
 0x12e   : > { %v1202_v43 = vpop.f32.mrb[2].mxu0  ;;  %v553_v44 = vmax.f32 %v475_v42, 0.0 }
 0x12f   : > { %v490_v46 = vadd.f32 %v1202_v43, %v1900_v38  ;;  %v484_v47 = vpop.f32.mrb[3].mxu0 }
 0x130   : > { %v485_v48 = vadd.f32 %v1900_v38, %v484_v47  ;;  %1253 = vmatprep.mubr.f32.mxu1 %v553_v44 }
 0x131   : > { %1254 = vmatmul.mubr.f32.vlgmr.msra.gmra.mrb[0].mxu1 %v554_v45  ;;  %v556_v51 = vmax.f32 %v490_v46, 0.0 }
 0x132   : > { %v555_v49 = vmax.f32 %v485_v48, 0.0  ;;  %v1205_v50 = vpop.f32.mrb[4].mxu0  ;;  %1437 = vmatpush3.bf16.msra.mxu1 %v1397_v20 }
 0x133   : > { %v500_v52 = vadd.f32 %v1205_v50, %v1900_v38  ;;  %v494_v53 = vpop.f32.mrb[5].mxu0  ;;  %1430 = vmatprep.subr.bf16.mxu1 %v1401_v22 }
 0x134   : > { %v495_v54 = vadd.f32 %v1900_v38, %v494_v53  ;;  %1256 = vmatprep.mubr.f32.mxu1 %v555_v49 }
 0x135   : > { %1257 = vmatmul.mubr.f32.gmra.mrb[2].mxu1 %v556_v51  ;;  %v558_v57 = vmax.f32 %v500_v52, 0.0 }
 0x136   : > { %v557_v55 = vmax.f32 %v495_v54, 0.0  ;;  %v1208_v56 = vpop.f32.mrb[6].mxu0  ;;  %1438 = vmatpush3.bf16.msra.mxu1 %v1401_v22 }
 0x137   : > { %v510_v58 = vadd.f32 %v1208_v56, %v1900_v38  ;;  %v504_v59 = vpop.f32.mrb[7].mxu0  ;;  %1431 = vmatprep.subr.bf16.mxu1 %v1405_v25 }
 0x138   : > { %v505_v60 = vadd.f32 %v1900_v38, %v504_v59  ;;  %1259 = vmatprep.mubr.f32.mxu1 %v557_v55 }
 0x139   : > { %1260 = vmatmul.mubr.f32.gmra.mrb[4].mxu1 %v558_v57  ;;  %v560_v63 = vmax.f32 %v510_v58, 0.0 }
 0x13a   : > { %v559_v61 = vmax.f32 %v505_v60, 0.0  ;;  %v1211_v62 = vpop.f32.mrb[8].mxu0  ;;  %1439 = vmatpush3.bf16.msra.mxu1 %v1405_v25  ;;  %v1425_v25 = vpack.c.bf16 %v768_v24, %v767_v23 }
 0x13b   : > { %v520_v0 = vadd.f32 %v1211_v62, %v1900_v38  ;;  %v514_v1 = vpop.f32.mrb[9].mxu0  ;;  %1432 = vmatprep.subr.bf16.mxu1 %v1881_v28 }
 0x13c   : > { %v515_v2 = vadd.f32 %v1900_v38, %v514_v1  ;;  %1262 = vmatprep.mubr.f32.mxu1 %v559_v61  ;;  %1426 = vmatprep.subr.bf16.mxu0 %v1425_v25 }
 0x13d   : > { %1263 = vmatmul.mubr.f32.gmra.mrb[6].mxu1 %v560_v63  ;;  %v562_v5 = vmax.f32 %v520_v0, 0.0  ;;  %1428 = vmatpush3.bf16.msra.mxu0 %v1425_v25 }
 0x13e   : > { %v561_v3 = vmax.f32 %v515_v2, 0.0  ;;  %v1214_v4 = vpop.f32.mrb[10].mxu0  ;;  %1440 = vmatpush3.bf16.msra.mxu1 %v1881_v28 }
 0x13f   : > { %v530_v6 = vadd.f32 %v1214_v4, %v1900_v38  ;;  %v524_v7 = vpop.f32.mrb[11].mxu0  ;;  %1433 = vmatprep.subr.bf16.mxu1 %v1884_v31 }
 0x140   : > { %v525_v8 = vadd.f32 %v1900_v38, %v524_v7  ;;  %1265 = vmatprep.mubr.f32.mxu1 %v561_v3 }
 0x141   : > { %1266 = vmatmul.mubr.f32.gmra.mrb[8].mxu1 %v562_v5  ;;  %v564_v11 = vmax.f32 %v530_v6, 0.0 }
 0x142   : > { %v563_v9 = vmax.f32 %v525_v8, 0.0  ;;  %v1217_v10 = vpop.f32.mrb[12].mxu0  ;;  %1441 = vmatpush3.bf16.msra.mxu1 %v1884_v31 }
 0x143   : > { %v540_v12 = vadd.f32 %v1217_v10, %v1900_v38  ;;  %v534_v13 = vpop.f32.mrb[13].mxu0  ;;  %1434 = vmatprep.subr.bf16.mxu1 %v1888_v34 }
 0x144   : > { %v535_v14 = vadd.f32 %v1900_v38, %v534_v13  ;;  %1268 = vmatprep.mubr.f32.mxu1 %v563_v9 }
 0x145   : > { %1269 = vmatmul.mubr.f32.gmra.mrb[10].mxu1 %v564_v11  ;;  %v566_v17 = vmax.f32 %v540_v12, 0.0  ;;  %v1058_v11 = vld [vmem:[%s2022_s6] ss:$0 sm:$0xff] }
 0x146   : > { %v565_v15 = vmax.f32 %v535_v14, 0.0  ;;  %v1220_v16 = vpop.f32.mrb[14].mxu0  ;;  %1442 = vmatpush3.bf16.msra.mxu1 %v1888_v34 }
 0x147   : > { %v550_v18 = vadd.f32 %v1220_v16, %v1900_v38  ;;  %v544_v19 = vpop.f32.mrb[15].mxu0  ;;  %1435 = vmatprep.subr.bf16.mxu1 %v1892_v37 }
 0x148   : > { %v545_v20 = vadd.f32 %v1900_v38, %v544_v19  ;;  %1271 = vmatprep.mubr.f32.mxu1 %v565_v15 }
 0x149   : > { %1272 = vmatmul.mubr.f32.gmra.mrb[12].mxu1 %v566_v17  ;;  %v568_v22 = vmax.f32 %v550_v18, 0.0 }
 0x14a   : > { %v567_v21 = vmax.f32 %v545_v20, 0.0  ;;  %1443 = vmatpush3.bf16.msra.mxu1 %v1892_v37 }
 0x14b   : > { %1436 = vmatprep.subr.bf16.mxu1 %v1425_v25 }
 0x14c   : > { %1274 = vmatprep.mubr.f32.mxu1 %v567_v21 }
 0x14d   : > { %1275 = vmatmul.mubr.f32.gmra.mrb[14].mxu1 %v568_v22 }
 0x14e   : > { %1444 = vmatpush3.bf16.msra.mxu1 %v1425_v25 }
 0x204   : > { %v1255_v27 = vpop.f32.mrb[0].mxu1 }
 0x205   : > { %v664_v28 = vadd.f32 %v1255_v27, %v1057_v26  ;;  %v658_v29 = vpop.f32.mrb[1].mxu1 }
 0x206   : > { %v659_v30 = vadd.f32 %v1057_v26, %v658_v29 }
 0x207   : > { %v738_v33 = vmax.f32 %v664_v28, 0.0 }
 0x208   : > { %v737_v31 = vmax.f32 %v659_v30, 0.0  ;;  %v1258_v32 = vpop.f32.mrb[2].mxu1 }
 0x209   : > { %v674_v34 = vadd.f32 %v1258_v32, %v1057_v26  ;;  %v668_v35 = vpop.f32.mrb[3].mxu1 }
 0x20a   : > { %v669_v36 = vadd.f32 %v1057_v26, %v668_v35  ;;  %1309 = vmatprep.mubr.f32.mxu0 %v737_v31 }
 0x20b   : > { %1310 = vmatmul.mubr.f32.vlgmr.msra.gmra.mrb[16].mxu0 %v738_v33  ;;  %v740_v39 = vmax.f32 %v674_v34, 0.0 }
 0x20c   : > { %v739_v37 = vmax.f32 %v669_v36, 0.0  ;;  %v1261_v38 = vpop.f32.mrb[4].mxu1 }
 0x20d   : > { %v684_v40 = vadd.f32 %v1261_v38, %v1057_v26  ;;  %v678_v41 = vpop.f32.mrb[5].mxu1 }
 0x20e   : > { %v679_v42 = vadd.f32 %v1057_v26, %v678_v41  ;;  %1312 = vmatprep.mubr.f32.mxu0 %v739_v37 }
 0x20f   : > { %1313 = vmatmul.mubr.f32.gmra.mrb[18].mxu0 %v740_v39  ;;  %v742_v45 = vmax.f32 %v684_v40, 0.0 }
 0x210   : > { %v741_v43 = vmax.f32 %v679_v42, 0.0  ;;  %v1264_v44 = vpop.f32.mrb[6].mxu1 }
 0x211   : > { %v694_v46 = vadd.f32 %v1264_v44, %v1057_v26  ;;  %v688_v47 = vpop.f32.mrb[7].mxu1 }
 0x212   : > { %v689_v48 = vadd.f32 %v1057_v26, %v688_v47  ;;  %1315 = vmatprep.mubr.f32.mxu0 %v741_v43 }
 0x213   : > { %1316 = vmatmul.mubr.f32.gmra.mrb[20].mxu0 %v742_v45  ;;  %v744_v51 = vmax.f32 %v694_v46, 0.0 }
 0x214   : > { %v743_v49 = vmax.f32 %v689_v48, 0.0  ;;  %v1267_v50 = vpop.f32.mrb[8].mxu1 }
 0x215   : > { %v704_v52 = vadd.f32 %v1267_v50, %v1057_v26  ;;  %v698_v53 = vpop.f32.mrb[9].mxu1 }
 0x216   : > { %v699_v54 = vadd.f32 %v1057_v26, %v698_v53  ;;  %1318 = vmatprep.mubr.f32.mxu0 %v743_v49 }
 0x217   : > { %1319 = vmatmul.mubr.f32.gmra.mrb[22].mxu0 %v744_v51  ;;  %v746_v57 = vmax.f32 %v704_v52, 0.0 }
 0x218   : > { %v745_v55 = vmax.f32 %v699_v54, 0.0  ;;  %v1270_v56 = vpop.f32.mrb[10].mxu1 }
 0x219   : > { %v714_v58 = vadd.f32 %v1270_v56, %v1057_v26  ;;  %v708_v59 = vpop.f32.mrb[11].mxu1 }
 0x21a   : > { %v709_v60 = vadd.f32 %v1057_v26, %v708_v59  ;;  %1321 = vmatprep.mubr.f32.mxu1 %v745_v55 }
 0x21b   : > { %1322 = vmatmul.mubr.f32.vlgmr.msra.gmra.mrb[16].mxu1 %v746_v57  ;;  %v748_v63 = vmax.f32 %v714_v58, 0.0 }
 0x21c   : > { %v747_v61 = vmax.f32 %v709_v60, 0.0  ;;  %v1273_v62 = vpop.f32.mrb[12].mxu1 }
 0x21d   : > { %v724_v0 = vadd.f32 %v1273_v62, %v1057_v26  ;;  %v718_v1 = vpop.f32.mrb[13].mxu1 }
 0x21e   : > { %v719_v2 = vadd.f32 %v1057_v26, %v718_v1  ;;  %1324 = vmatprep.mubr.f32.mxu1 %v747_v61 }
 0x21f   : > { %1325 = vmatmul.mubr.f32.gmra.mrb[18].mxu1 %v748_v63  ;;  %v750_v5 = vmax.f32 %v724_v0, 0.0 }
 0x220   : > { %v749_v3 = vmax.f32 %v719_v2, 0.0  ;;  %v1276_v4 = vpop.f32.mrb[14].mxu1 }
 0x221   : > { %v734_v6 = vadd.f32 %v1276_v4, %v1057_v26  ;;  %v728_v7 = vpop.f32.mrb[15].mxu1 }
 0x222   : > { %v729_v8 = vadd.f32 %v1057_v26, %v728_v7  ;;  %1327 = vmatprep.mubr.f32.mxu1 %v749_v3 }
 0x223   : > { %1328 = vmatmul.mubr.f32.gmra.mrb[20].mxu1 %v750_v5  ;;  %v752_v10 = vmax.f32 %v734_v6, 0.0 }
 0x224   : > { %v751_v9 = vmax.f32 %v729_v8, 0.0 }
 0x226   : > { %1330 = vmatprep.mubr.f32.mxu1 %v751_v9 }
 0x227   : > { %1331 = vmatmul.mubr.f32.gmra.mrb[22].mxu1 %v752_v10 }
 0x2de   : > { %v1311_v12 = vpop.f32.mrb[16].mxu0 }
 0x2df   : > { %v848_v13 = vadd.f32 %v1311_v12, %v1058_v11  ;;  %v842_v14 = vpop.f32.mrb[17].mxu0 }
 0x2e0   : > { %v843_v15 = vadd.f32 %v1058_v11, %v842_v14 }
 0x2e1   : > { %v922_v16 = vmax.f32 %v848_v13, 0.0 }
 0x2e2   : > { %v921_v17 = vmax.f32 %v843_v15, 0.0  ;;  %v1314_v18 = vpop.f32.mrb[18].mxu0 }
 0x2e3   : > { %938 = vst [vmem:[%s1935_s17 + $0x8] sm:$0xff] %v922_v16  ;;  %v858_v19 = vadd.f32 %v1314_v18, %v1058_v11  ;;  %v852_v20 = vpop.f32.mrb[19].mxu0 }
 0x2e4   : > { %937 = vst [vmem:[%s1935_s17] sm:$0xff] %v921_v17  ;;  %v853_v21 = vadd.f32 %v1058_v11, %v852_v20 }
 0x2e5   : > { %v924_v22 = vmax.f32 %v858_v19, 0.0 }
 0x2e6   : > { %v923_v23 = vmax.f32 %v853_v21, 0.0  ;;  %v1317_v24 = vpop.f32.mrb[20].mxu0 }
 0x2e7   : > { %940 = vst [vmem:[%s1935_s17 + $0x18] sm:$0xff] %v924_v22  ;;  %v868_v25 = vadd.f32 %v1317_v24, %v1058_v11  ;;  %v862_v26 = vpop.f32.mrb[21].mxu0 }
 0x2e8   : > { %939 = vst [vmem:[%s1935_s17 + $0x10] sm:$0xff] %v923_v23  ;;  %v863_v27 = vadd.f32 %v1058_v11, %v862_v26 }
 0x2e9   : > { %v926_v28 = vmax.f32 %v868_v25, 0.0 }
 0x2ea   : > { %v925_v29 = vmax.f32 %v863_v27, 0.0  ;;  %v1320_v30 = vpop.f32.mrb[22].mxu0 }
 0x2eb   : > { %942 = vst [vmem:[%s1935_s17 + $0x28] sm:$0xff] %v926_v28  ;;  %v878_v31 = vadd.f32 %v1320_v30, %v1058_v11  ;;  %v872_v32 = vpop.f32.mrb[23].mxu0 }
 0x2ec   : > { %941 = vst [vmem:[%s1935_s17 + $0x20] sm:$0xff] %v925_v29  ;;  %v873_v33 = vadd.f32 %v1058_v11, %v872_v32 }
 0x2ed   : > { %v928_v34 = vmax.f32 %v878_v31, 0.0 }
 0x2ee   : > { %v927_v35 = vmax.f32 %v873_v33, 0.0  ;;  %v1323_v36 = vpop.f32.mrb[16].mxu1 }
 0x2ef   : > { %944 = vst [vmem:[%s1935_s17 + $0x38] sm:$0xff] %v928_v34  ;;  %v888_v37 = vadd.f32 %v1323_v36, %v1058_v11  ;;  %v882_v38 = vpop.f32.mrb[17].mxu1 }
 0x2f0   : > { %943 = vst [vmem:[%s1935_s17 + $0x30] sm:$0xff] %v927_v35  ;;  %v883_v39 = vadd.f32 %v1058_v11, %v882_v38 }
 0x2f1   : > { %v930_v40 = vmax.f32 %v888_v37, 0.0 }
 0x2f2   : > { %v929_v41 = vmax.f32 %v883_v39, 0.0  ;;  %v1326_v42 = vpop.f32.mrb[18].mxu1 }
 0x2f3   : > { %946 = vst [vmem:[%s1935_s17 + $0x48] sm:$0xff] %v930_v40  ;;  %v898_v43 = vadd.f32 %v1326_v42, %v1058_v11  ;;  %v892_v44 = vpop.f32.mrb[19].mxu1 }
 0x2f4   : > { %945 = vst [vmem:[%s1935_s17 + $0x40] sm:$0xff] %v929_v41  ;;  %v893_v45 = vadd.f32 %v1058_v11, %v892_v44 }
 0x2f5   : > { %v932_v46 = vmax.f32 %v898_v43, 0.0 }
 0x2f6   : > { %v931_v47 = vmax.f32 %v893_v45, 0.0  ;;  %v1329_v48 = vpop.f32.mrb[20].mxu1 }
 0x2f7   : > { %948 = vst [vmem:[%s1935_s17 + $0x58] sm:$0xff] %v932_v46  ;;  %v908_v49 = vadd.f32 %v1329_v48, %v1058_v11  ;;  %v902_v50 = vpop.f32.mrb[21].mxu1 }
 0x2f8   : > { %947 = vst [vmem:[%s1935_s17 + $0x50] sm:$0xff] %v931_v47  ;;  %v903_v51 = vadd.f32 %v1058_v11, %v902_v50 }
 0x2f9   : > { %v934_v52 = vmax.f32 %v908_v49, 0.0 }
 0x2fa   : > { %v933_v53 = vmax.f32 %v903_v51, 0.0  ;;  %v1332_v54 = vpop.f32.mrb[22].mxu1  ;;  %960 = sbr.rel (!%p2033_p6) target bundleno = 797 (0x31d), region = 56 }
 0x2fb   : > { %950 = vst [vmem:[%s1935_s17 + $0x68] sm:$0xff] %v934_v52  ;;  %v918_v55 = vadd.f32 %v1332_v54, %v1058_v11  ;;  %v912_v56 = vpop.f32.mrb[23].mxu1 }
 0x2fc   : > { %949 = vst [vmem:[%s1935_s17 + $0x60] sm:$0xff] %v933_v53  ;;  %v913_v57 = vadd.f32 %v1058_v11, %v912_v56 }
 0x2fd   : > { %v936_v58 = vmax.f32 %v918_v55, 0.0 }
 0x2fe   : > { %v935_v59 = vmax.f32 %v913_v57, 0.0 }
 0x2ff   : > { %952 = vst [vmem:[%s1935_s17 + $0x78] sm:$0xff] %v936_v58 }
 0x300   : > { %951 = vst [vmem:[%s1935_s17 + $0x70] sm:$0xff] %v935_v59 }
 0x301   : > { %s2040_s16 = smov (!%p963_p9, %s962_s16), 16 }
 0x302   : > { %s1960_s19 = sshll.u32 %s2040_s16, 7 }
 0x303   : > { %s967_s21 = ssub.s32 2048, %s1960_s19 }
 0x304   : > { %968 = vsyncadd %s1955_s13, %s967_s21  ;;  %p1062_p10 = scmp.ne.s32.totalorder %s1960_s19, 0  ;;  %s1068_s22 = sshll.u32 %s1663_s28, 11 }
 0x305   : > { %s1969_s15 = scalar_lea.hbm %s2023_s7, %s1068_s22  ;;  %s973_s18 = sshll.u32 %s1935_s17, 4  ;;  %s1972_s18 = int_to_ptr.vmem [resolvable:$true] %s973_s18 }
 0x306   : > { %s1527_s20 = scalar_lea.vmem %s1972_s18, %s1960_s19  ;;  %s1599_s29 = smov [#allocation6]  }
 0x307   : > { %p1528_p12 = scmp.ne.s32.totalorder %s1972_s18, %s1527_s20  ;;  %s1531_s8 = sshll.u32 %s1599_s29, 4  ;;  %s1532_s8 = int_to_ptr.vmem [resolvable:$false] %s1531_s8 }
 0x308   : > { %s1533_s28 = scalar_lea.vmem %s1532_s8, 4096  ;;  %p1534_p4 = scmp.lt.s32.totalorder %s1972_s18, %s1532_s8 }
 0x309   : > { %p1529_p2 = pnand %p1528_p12, %p1062_p10  ;;  %p1535_p7 = scmp.lt.s32.totalorder %s1533_s28, %s1527_s20 }
 0x30b   : > { %p1530_p3 = pneg %p1529_p2  ;;  %p1536_p8 = por %p1535_p7, %p1534_p4 }
 0x30d   : > { %p1537_p11 = pnand %p1536_p8, %p1530_p3 }
 0x30f   : > { %1540 = shalt.err (!%p1537_p11)
}
 0x310   : > { %s1541_s9 = scalar_lea.hbm %s1969_s15, %s1960_s19  ;;  %s1545_s16 = scalar_lea.hbm %s2023_s7, 3200 }
 0x311   : > { %p1542_p13 = scmp.ne.s32.totalorder %s1969_s15, %s1541_s9  ;;  %p1546_p5 = scmp.lt.u32.totalorder %s1969_s15, %s2023_s7 }
 0x312   : > { %p1547_p6 = scmp.lt.u32.totalorder %s1545_s16, %s1541_s9  ;;  %p1549_p12 = scmp.lt.u32.totalorder %s1541_s9, %s1969_s15 }
 0x313   : > { %p1543_p1 = pnand %p1542_p13, %p1062_p10 }
 0x314   : > { %p1548_p9 = por %p1547_p6, %p1546_p5 }
 0x315   : > { %p1544_p0 = pneg %p1543_p1 }
 0x316   : > { %p1550_p2 = por %p1549_p12, %p1548_p9 }
 0x318   : > { %p1551_p3 = pnand %p1550_p2, %p1544_p0 }
 0x31a   : > { %1554 = shalt.err (!%p1551_p3)
}
 0x31b   : > { %s1600_s23 = smov 128   ;;  %s1601_s11 = smov 8  }
 0x31c   : > { %979 = dma.vmem_to_hbm [thread:$0]  (%p1062_p10), %s1972_s18, %s1960_s19, %s1969_s15, %s1955_s13, %s1600_s23, %s1600_s23, %s1601_s11  }
 0x31d PF: > { %p1460_p4 = scmp.ge.s32.totalorder %s1593_s27, 2  ;;  %s988_s20 = sand.u32 1, %s1581_s24  }
 0x31e   : > { %p2034_p7 = scmp.ne.s32.totalorder %s2027_s12, 0  ;;  %s989_s29 = scalar_lea.sflag [#allocation5], %s988_s20 }
 0x320   : > { %p1455_p8 = pnand %p1460_p4, %p2034_p7 }
 0x322   : > { %1576 = dma.done.wait (!%p1455_p8), %s989_s29, 2048  }
 0x323   : > { %1578 = vsyncadd (!%p1455_p8), %s989_s29, 4294965248  ;;  %p18_p11 = scmp.ge.s32.totalorder %s1667_s30, 4   ;;  %s2035_s24 = smov %s1585_s25 }
 0x324   : > { %s2036_s25 = smov %s1589_s26  ;;  %s2037_s26 = smov %s1678_s10 }
 0x325   : > { %s2038_s27 = smov %s1667_s30  ;;  %20 = sbr.rel (!%p18_p11) target bundleno = 4 (0x4), region = 88 }
 0x32c   :  { %994 = vsyncpa [#allocation4], 1 }
 0x32d   :  { %996 = vsyncpa [#allocation4 + $0x1], 1 }
 0x32e   :  { %997 = vsyncpa [#allocation5], 1 }
 0x32f   :  { %999 = vsyncpa [#allocation5 + $0x1], 1 }

</bundles_post_ra>
